<compile_context>
chip_gen: v6e
topology: v6e:2x2x1
jax: 0.10.0
libtpu: 0.0.40
codegen_flags: <defaults>
</compile_context>

<pallas_src>
import jax
import jax.numpy as jnp
from jax.experimental import pallas as pl
from jax.experimental.pallas import tpu as pltpu


def _round_up(x, m):
    return ((x + m - 1) // m) * m


def icm_forward_kernel(s_ref, a_ref, w1_ref, b1_ref, w2_ref, b2_ref, o_ref):
    # s_ref: [tb, F] f32    a_ref: [tb, A] f32
    # w1   : [F+A, H] bf16  b1   : [1, H] f32
    # w2   : [H, F]   bf16  b2   : [1, F] f32
    # o    : [tb, F] bf16
    F = s_ref.shape[-1]
    dt = w1_ref.dtype
    # Layer 1: the concat never materializes -- two MXU dots against static
    # row-slices of W1 (static ref slices are free), f32 accumulation.
    h = jnp.dot(s_ref[...].astype(dt), w1_ref[:F, :],
                preferred_element_type=jnp.float32)
    h = h + jnp.dot(a_ref[...].astype(dt), w1_ref[F:, :],
                    preferred_element_type=jnp.float32)
    h = jnp.maximum(h + b1_ref[...], 0.0)            # bias + ReLU in f32 (VPU)
    # Layer 2: bf16 activations into the MXU, f32 accumulation, f32 bias.
    out = jnp.dot(h.astype(w2_ref.dtype), w2_ref[...],
                  preferred_element_type=jnp.float32) + b2_ref[...]
    o_ref[...] = out.astype(o_ref.dtype)


def icm_forward(state_features, actions, params, *, tb=None, max_tb=2048,
                out_dtype=jnp.bfloat16):
    """Pallas-backed ICMForwardModel.forward.

    params = (w1 [F+A,H] bf16, b1 [1,H] f32, w2 [H,F] bf16, b2 [1,F] f32)
    """
    w1, b1, w2, b2 = params
    B, F = state_features.shape
    _, A = actions.shape
    Fin, H = w1.shape
    assert Fin == F + A and w2.shape == (H, F)
    assert b1.shape == (1, H) and b2.shape == (1, F)

    # Batch tile: run the whole batch in one grid step whenever B <= max_tb
    # (latency-bound kernel).  For larger B, balance the tiles so per-tile
    # padding is < 8 rows instead of padding B up to a fixed tb.
    if tb is None:
        n_steps = max(1, pl.cdiv(B, max_tb))
        tb = _round_up(pl.cdiv(B, n_steps), 8)
    else:
        assert tb % 8 == 0, "tb must be a multiple of 8 (sublane constraint)"
    Bp = _round_up(B, tb)

    s, a = state_features, actions
    if Bp != B:
        s = jnp.pad(s, ((0, Bp - B), (0, 0)))
        a = jnp.pad(a, ((0, Bp - B), (0, 0)))

    # Advisory cost hint: lets XLA schedule/overlap this tiny custom call.
    flops = 2 * Bp * (Fin * H + H * F)
    bytes_accessed = (
        s.size * s.dtype.itemsize + a.size * a.dtype.itemsize
        + w1.size * w1.dtype.itemsize + b1.size * b1.dtype.itemsize
        + w2.size * w2.dtype.itemsize + b2.size * b2.dtype.itemsize
        + Bp * F * jnp.dtype(out_dtype).itemsize)
    cost = pl.CostEstimate(flops=flops, transcendentals=0,
                           bytes_accessed=bytes_accessed)

    grid = (Bp // tb,)
    out = pl.pallas_call(
        icm_forward_kernel,
        out_shape=jax.ShapeDtypeStruct((Bp, F), out_dtype),
        grid_spec=pltpu.PrefetchScalarGridSpec(
            num_scalar_prefetch=0,
            grid=grid,
            in_specs=[
                pl.BlockSpec((tb, F), lambda i: (i, 0)),     # state_features
                pl.BlockSpec((tb, A), lambda i: (i, 0)),     # actions
                # Weights/biases: constant index_map -> resident across steps.
                pl.BlockSpec((Fin, H), lambda i: (0, 0)),    # W1
                pl.BlockSpec((1, H), lambda i: (0, 0)),      # b1
                pl.BlockSpec((H, F), lambda i: (0, 0)),      # W2
                pl.BlockSpec((1, F), lambda i: (0, 0)),      # b2
            ],
            out_specs=pl.BlockSpec((tb, F), lambda i: (i, 0)),
        ),
        compiler_params=pltpu.CompilerParams(
            # Independent batch tiles; only relevant when grid has >1 step
            # (lets v7x's two TensorCores split it), harmless for grid=(1,).
            dimension_semantics=("parallel",)),
        cost_estimate=cost,
    )(s, a, w1, b1, w2, b2)
    return out[:B]


def init_params(key, feature_dim, action_dim, hidden=256):
    """Deterministic init mimicking nn.Linear default (uniform +-1/sqrt(fan_in)).

    Weights are returned in bf16 (kernel dtype); biases stay f32.
    W1 is stored as [in_dim, hidden], W2 as [hidden, feature_dim]
    (pre-transposed vs torch's [out, in]).
    """
    in_dim = feature_dim + action_dim
    k1, k2, k3, k4 = jax.random.split(key, 4)
    lim1 = 1.0 / jnp.sqrt(in_dim)
    lim2 = 1.0 / jnp.sqrt(hidden)
    w1 = jax.random.uniform(k1, (in_dim, hidden), jnp.float32, -lim1, lim1)
    b1 = jax.random.uniform(k2, (1, hidden), jnp.float32, -lim1, lim1)
    w2 = jax.random.uniform(k3, (hidden, feature_dim), jnp.float32, -lim2, lim2)
    b2 = jax.random.uniform(k4, (1, feature_dim), jnp.float32, -lim2, lim2)
    return (w1.astype(jnp.bfloat16), b1, w2.astype(jnp.bfloat16), b2)


def reference_forward(state_features, actions, params):
    """Pure-JAX reference with the same bf16 rounding points as the kernel."""
    w1, b1, w2, b2 = params
    x = jnp.concatenate([state_features, actions], axis=-1)
    x = x.astype(jnp.bfloat16).astype(jnp.float32)
    h = jnp.maximum(x @ w1.astype(jnp.float32) + b1, 0.0)
    h = h.astype(jnp.bfloat16).astype(jnp.float32)
    return h @ w2.astype(jnp.float32) + b2


if __name__ == "__main__":
    # Small but representative ICM shapes: feature_dim=32, action_dim=8.
    B, feature_dim, action_dim = 64, 32, 8   # -> tb=64, grid=(1,)

    key = jax.random.PRNGKey(0)
    kp, ks, ka = jax.random.split(key, 3)
    params = init_params(kp, feature_dim, action_dim)
    state_features = jax.random.normal(ks, (B, feature_dim), jnp.float32)
    actions = jax.random.normal(ka, (B, action_dim), jnp.float32)

    out = icm_forward(state_features, actions, params)
    out = jax.block_until_ready(out)

    ref = reference_forward(state_features, actions, params)
    assert out.shape == (B, feature_dim)
    assert out.dtype == jnp.bfloat16
    # bf16 weights/activations/output -> loose tolerance vs the f32 reference.
    assert jnp.allclose(out.astype(jnp.float32), ref, atol=3e-2, rtol=3e-2), \
        "mismatch vs reference"

    print("KERNEL_OK")
</pallas_src>

<mosaic_0001>
module attributes {stable_mosaic.version = 11 : i64} {
  func.func @icm_forward_kernel(%arg0: i32, %arg1: memref<64x32xf32, #tpu.memory_space<vmem>>, %arg2: memref<64x8xf32, #tpu.memory_space<vmem>>, %arg3: memref<40x256xbf16, #tpu.memory_space<vmem>>, %arg4: memref<1x256xf32, #tpu.memory_space<vmem>>, %arg5: memref<256x32xbf16, #tpu.memory_space<vmem>>, %arg6: memref<1x32xf32, #tpu.memory_space<vmem>>, %arg7: memref<64x32xbf16, #tpu.memory_space<vmem>>) attributes {dimension_semantics = [#tpu.dimension_semantics<parallel>], iteration_bounds = array<i64: 1>, scalar_prefetch = 0 : i64, scratch_operands = 0 : i64, tpu.core_type = #tpu.core_type<tc>, window_params = [{transform_indices = @transform_0, window_bounds = array<i64: 64, 32>}, {transform_indices = @transform_1, window_bounds = array<i64: 64, 8>}, {pipeline_mode = #tpu.pipeline_mode<synchronous>, transform_indices = @transform_2, window_bounds = array<i64: 40, 256>}, {pipeline_mode = #tpu.pipeline_mode<synchronous>, transform_indices = @transform_3, window_bounds = array<i64: 1, 256>}, {pipeline_mode = #tpu.pipeline_mode<synchronous>, transform_indices = @transform_4, window_bounds = array<i64: 256, 32>}, {pipeline_mode = #tpu.pipeline_mode<synchronous>, transform_indices = @transform_5, window_bounds = array<i64: 1, 32>}, {transform_indices = @transform_6, window_bounds = array<i64: 64, 32>}]} {
    %c0 = arith.constant 0 : index
    %c0_0 = arith.constant 0 : index
    %0 = vector.load %arg1[%c0, %c0_0] : memref<64x32xf32, #tpu.memory_space<vmem>>, vector<64x32xf32>
    %1 = arith.truncf %0 : vector<64x32xf32> to vector<64x32xbf16>
    %c0_1 = arith.constant 0 : index
    %c0_2 = arith.constant 0 : index
    %2 = vector.load %arg3[%c0_1, %c0_2] : memref<40x256xbf16, #tpu.memory_space<vmem>>, vector<32x256xbf16>
    %cst = arith.constant dense<0.000000e+00> : vector<64x256xf32>
    %3 = tpu.matmul %1, %2, %cst {dimension_numbers = #tpu.dot_dimension_numbers<[1], [0], [0], [1], [0, 0, 1, 1], [], []>} : vector<64x32xbf16>, vector<32x256xbf16>, vector<64x256xf32> -> vector<64x256xf32>
    %c0_3 = arith.constant 0 : index
    %c0_4 = arith.constant 0 : index
    %4 = vector.load %arg2[%c0_3, %c0_4] : memref<64x8xf32, #tpu.memory_space<vmem>>, vector<64x8xf32>
    %5 = arith.truncf %4 : vector<64x8xf32> to vector<64x8xbf16>
    %c32 = arith.constant 32 : index
    %c0_5 = arith.constant 0 : index
    %6 = vector.load %arg3[%c32, %c0_5] : memref<40x256xbf16, #tpu.memory_space<vmem>>, vector<8x256xbf16>
    %cst_6 = arith.constant dense<0.000000e+00> : vector<64x256xf32>
    %7 = tpu.matmul %5, %6, %cst_6 {dimension_numbers = #tpu.dot_dimension_numbers<[1], [0], [0], [1], [0, 0, 1, 1], [], []>} : vector<64x8xbf16>, vector<8x256xbf16>, vector<64x256xf32> -> vector<64x256xf32>
    %8 = arith.addf %3, %7 : vector<64x256xf32>
    %c0_7 = arith.constant 0 : index
    %c0_8 = arith.constant 0 : index
    %9 = vector.load %arg4[%c0_7, %c0_8] : memref<1x256xf32, #tpu.memory_space<vmem>>, vector<1x256xf32>
    %10 = vector.broadcast %9 : vector<1x256xf32> to vector<64x256xf32>
    %11 = arith.addf %8, %10 : vector<64x256xf32>
    %cst_9 = arith.constant 0.000000e+00 : f32
    %12 = vector.broadcast %cst_9 : f32 to vector<64x256xf32>
    %13 = arith.maximumf %11, %12 : vector<64x256xf32>
    %14 = arith.truncf %13 : vector<64x256xf32> to vector<64x256xbf16>
    %c0_10 = arith.constant 0 : index
    %c0_11 = arith.constant 0 : index
    %15 = vector.load %arg5[%c0_10, %c0_11] : memref<256x32xbf16, #tpu.memory_space<vmem>>, vector<256x32xbf16>
    %cst_12 = arith.constant dense<0.000000e+00> : vector<64x32xf32>
    %16 = tpu.matmul %14, %15, %cst_12 {dimension_numbers = #tpu.dot_dimension_numbers<[1], [0], [0], [1], [0, 0, 1, 1], [], []>} : vector<64x256xbf16>, vector<256x32xbf16>, vector<64x32xf32> -> vector<64x32xf32>
    %c0_13 = arith.constant 0 : index
    %c0_14 = arith.constant 0 : index
    %17 = vector.load %arg6[%c0_13, %c0_14] : memref<1x32xf32, #tpu.memory_space<vmem>>, vector<1x32xf32>
    %18 = vector.broadcast %17 : vector<1x32xf32> to vector<64x32xf32>
    %19 = arith.addf %16, %18 : vector<64x32xf32>
    %20 = arith.truncf %19 : vector<64x32xf32> to vector<64x32xbf16>
    %c0_15 = arith.constant 0 : index
    %c0_16 = arith.constant 0 : index
    %21 = vector.load %arg7[%c0_15, %c0_16] : memref<64x32xbf16, #tpu.memory_space<vmem>>, vector<64x32xbf16>
    tpu.vector_store %arg7[%c0_15, %c0_16], %20 {strides = array<i32>} : memref<64x32xbf16, #tpu.memory_space<vmem>>, vector<64x32xbf16>,
    return
  }
  func.func @transform_0(%arg0: i32) -> (i32, i32) {
    %c0_i32 = arith.constant 0 : i32
    %c0_i32_0 = arith.constant 0 : i32
    return %arg0, %c0_i32 : i32, i32
  }
  func.func @transform_1(%arg0: i32) -> (i32, i32) {
    %c0_i32 = arith.constant 0 : i32
    %c0_i32_0 = arith.constant 0 : i32
    return %arg0, %c0_i32 : i32, i32
  }
  func.func @transform_2(%arg0: i32) -> (i32, i32) {
    %c0_i32 = arith.constant 0 : i32
    %c0_i32_0 = arith.constant 0 : i32
    %c0_i32_1 = arith.constant 0 : i32
    return %c0_i32, %c0_i32_0 : i32, i32
  }
  func.func @transform_3(%arg0: i32) -> (i32, i32) {
    %c0_i32 = arith.constant 0 : i32
    %c0_i32_0 = arith.constant 0 : i32
    %c0_i32_1 = arith.constant 0 : i32
    return %c0_i32, %c0_i32_0 : i32, i32
  }
  func.func @transform_4(%arg0: i32) -> (i32, i32) {
    %c0_i32 = arith.constant 0 : i32
    %c0_i32_0 = arith.constant 0 : i32
    %c0_i32_1 = arith.constant 0 : i32
    return %c0_i32, %c0_i32_0 : i32, i32
  }
  func.func @transform_5(%arg0: i32) -> (i32, i32) {
    %c0_i32 = arith.constant 0 : i32
    %c0_i32_0 = arith.constant 0 : i32
    %c0_i32_1 = arith.constant 0 : i32
    return %c0_i32, %c0_i32_0 : i32, i32
  }
  func.func @transform_6(%arg0: i32) -> (i32, i32) {
    %c0_i32 = arith.constant 0 : i32
    %c0_i32_0 = arith.constant 0 : i32
    return %arg0, %c0_i32 : i32, i32
  }
}

</mosaic_0001>

<bundles_post_ra>
// kernel: tpu_custom_call.1
= control target key start
LH: loop header
LB: loop body
LE: loop exit
PB: predicated region body
PF: predicated region fallthrough
CT: control target
= control target key end

     0   :  { %vm71_vm0 = vcmask 1043456   ;;  %v683_v1 = vmov 0   ;;  %vm58_vm1 = vcmask 64512   ;;  %vm171_vm2 = vcmask 261120   ;;  %s904_s2 = inlined_call_operand.vmem [shape: bf16[40,256], index: 2, kind: input, shape index: {}]   ;;  %s905_s1 = inlined_call_operand.vmem [shape: f32[64,8], index: 1, kind: input, shape index: {}]   ;;  %s906_s0 = inlined_call_operand.vmem [shape: f32[64,32], index: 0, kind: input, shape index: {}]   ;;  %s907_s4 = inlined_call_operand.vmem [shape: bf16[256,32], index: 4, kind: input, shape index: {}]   ;;  %s908_s3 = inlined_call_operand.vmem [shape: f32[1,256], index: 3, kind: input, shape index: {}]   ;;  %s909_s5 = inlined_call_operand.vmem [shape: f32[1,32], index: 5, kind: input, shape index: {}]   ;;  %s910_s6 = inlined_call_operand.vmem [shape: bf16[64,32], index: 6, kind: output, shape index: {}]  }
   0x1   :  { %v52_v0 = vld [vmem:[%s904_s2 + $0x20] sm:$0xff]  ;;  %110 = vmatprep.mubr.bf16.mxu0 %v683_v1  ;;  %216 = vmatprep.mubr.bf16.mxu1 %v683_v1  ;;  %v660_v3 = vld [vmem:[%s904_s2 + $0x14] ss:$8 sps:$4 sm:$0xff]   ;;  %v663_v5 = vld [vmem:[%s904_s2 + $0x10] ss:$8 sps:$4 sm:$0xff]   ;;  %v259_v49 = vlaneseq  ;;  %vm541_vm3 = vcmask 257024  }
   0x2   :  { %v555_v2 = vcombine.high %v52_v0, %v52_v0  ;;  %v554_v4 = vcombine.low %v52_v0, %v52_v0  ;;  %v40_v6 = vld [vmem:[%s905_s1] sm:$0xff]  ;;  %v41_v7 = vld [vmem:[%s905_s1 + $0x8] sm:$0xff]  ;;  %196 = vmatprep.subr.bf16.mxu1 %v660_v3  ;;  %v42_v15 = vld [vmem:[%s905_s1 + $0x10] sm:$0xff] }
   0x3   :  { %v48_v9 = vpack.c.bf16 %v41_v7, %v40_v6  ;;  %v664_v10 = vld [vmem:[%s904_s2 + $0x4] ss:$8 sps:$4 sm:$0xff]   ;;  %197 = vmatpush1.bf16.msra.mxu1 %v663_v5  ;;  %v666_v11 = vld [vmem:[%s904_s2] ss:$8 sps:$4 sm:$0xff]   ;;  %v43_v16 = vld [vmem:[%s905_s1 + $0x18] sm:$0xff]  ;;  %v260_v51 = vshrl.u32 %v259_v49, 7 }
   0x4   :  { %556 = vmatprep.subr.msk.bf16.mxu0 %vm71_vm0, %v555_v2  ;;  %v73_v8 = vsel %vm71_vm0, %v554_v4, 0  ;;  %v24_v12 = vld [vmem:[%s906_s0] sm:$0xff]  ;;  %v25_v13 = vld [vmem:[%s906_s0 + $0x8] sm:$0xff]  ;;  %198 = vmatprep.subr.bf16.mxu1 %v664_v10  ;;  %v667_v17 = vld [vmem:[%s907_s4 + $0x78] sm:$0xff]   ;;  %v49_v21 = vpack.c.bf16 %v43_v16, %v42_v15 }
   0x5   :  { %93 = vmatpush1.bf16.msra.mxu0 %v73_v8  ;;  %v32_v14 = vpack.c.bf16 %v25_v13, %v24_v12  ;;  %v26_v18 = vld [vmem:[%s906_s0 + $0x10] sm:$0xff]  ;;  %v27_v19 = vld [vmem:[%s906_s0 + $0x18] sm:$0xff]  ;;  %v671_v24 = vld [vmem:[%s907_s4 + $0x68] sm:$0xff]   ;;  %v265_v53 = vsub.s32 1, %v260_v51  ;;  %v261_v56 = vsub.s32 0, %v260_v51 }
   0x6   :  { %v668_v20 = vld [vmem:[%s907_s4 + $0x38] sm:$0xff]   ;;  %602 = vmatprep.subr.bf16.mxu0 %v667_v17  ;;  %v669_v22 = vld [vmem:[%s907_s4 + $0x70] sm:$0xff]   ;;  %v44_v25 = vld [vmem:[%s905_s1 + $0x20] sm:$0xff]  ;;  %v33_v28 = vpack.c.bf16 %v27_v19, %v26_v18 }
   0x7   :  { %199 = vmatpush1.bf16.msra.mxu1 %v666_v11  ;;  %v670_v23 = vld [vmem:[%s907_s4 + $0x30] sm:$0xff]   ;;  %v45_v26 = vld [vmem:[%s905_s1 + $0x28] sm:$0xff]  ;;  %v28_v29 = vld [vmem:[%s906_s0 + $0x20] sm:$0xff] }
   0x8   :  { %557 = vmatmul.mubr.msk.bf16.vlgmr.msra.gmra.mxu0 %vm58_vm1, %v48_v9  ;;  %642 = vmatprep.subr.bf16.mxu1 %v667_v17  ;;  %v672_v27 = vld [vmem:[%s907_s4 + $0x28] sm:$0xff]   ;;  %v50_v31 = vpack.c.bf16 %v45_v26, %v44_v25  ;;  %v46_v33 = vld [vmem:[%s905_s1 + $0x30] sm:$0xff]  ;;  %v47_v34 = vld [vmem:[%s905_s1 + $0x38] sm:$0xff] }
   0x9   :  { %120 = vmatprep.mubr.bf16.mxu0 %v683_v1  ;;  %603 = vmatpush3.bf16.msra.mxu0 %v668_v20  ;;  %v29_v30 = vld [vmem:[%s906_s0 + $0x28] sm:$0xff]  ;;  %v51_v35 = vpack.c.bf16 %v47_v34, %v46_v33  ;;  %v30_v36 = vld [vmem:[%s906_s0 + $0x30] sm:$0xff]  ;;  %v31_v37 = vld [vmem:[%s906_s0 + $0x38] sm:$0xff] }
   0xa   :  { %565 = vmatmul.mubr.msk.bf16.vlgmr.msra.gmra.mxu1 %vm171_vm2, %v32_v14  ;;  %604 = vmatprep.subr.bf16.mxu0 %v669_v22  ;;  %v34_v32 = vpack.c.bf16 %v29_v30, %v28_v29  ;;  %v35_v38 = vpack.c.bf16 %v31_v37, %v30_v36  ;;  %v673_v39 = vld [vmem:[%s907_s4 + $0x60] sm:$0xff]   ;;  %v675_v41 = vld [vmem:[%s907_s4 + $0x58] sm:$0xff]   ;;  %v677_v43 = vld [vmem:[%s907_s4 + $0x50] sm:$0xff]  }
   0xb   :  { %226 = vmatprep.mubr.bf16.mxu1 %v683_v1  ;;  %650 = vmatpush3.bf16.msra.mxu1 %v668_v20  ;;  %v674_v40 = vld [vmem:[%s907_s4 + $0x20] sm:$0xff]   ;;  %v676_v42 = vld [vmem:[%s907_s4 + $0x18] sm:$0xff]   ;;  %v678_v44 = vld [vmem:[%s907_s4 + $0x10] sm:$0xff]  }
   0xc   :  { %643 = vmatprep.subr.bf16.mxu1 %v669_v22  ;;  %v679_v45 = vld [vmem:[%s907_s4 + $0x48] sm:$0xff]   ;;  %v681_v47 = vld [vmem:[%s907_s4 + $0x40] sm:$0xff]  }
   0xd   :  { %605 = vmatpush3.bf16.msra.mxu0 %v670_v23  ;;  %v680_v46 = vld [vmem:[%s907_s4 + $0x8] sm:$0xff]   ;;  %v682_v48 = vld [vmem:[%s907_s4] sm:$0xff]  }
   0xe   :  { %606 = vmatprep.subr.bf16.mxu0 %v671_v24  ;;  %v257_v57 = vld [vmem:[%s908_s3] sm:$0x3] }
   0xf   :  { %651 = vmatpush3.bf16.msra.mxu1 %v670_v23  ;;  %v849_v61 = vrot.slane %v257_v57, %v265_v53  ;;  %v851_v63 = vrot.slane %v257_v57, %v261_v56 }
  0x10   :  { %558 = vmatmul.mubr.msk.bf16.gmra.mxu0 %vm58_vm1, %v49_v21  ;;  %644 = vmatprep.subr.bf16.mxu1 %v671_v24 }
  0x11   :  { %130 = vmatprep.mubr.bf16.mxu0 %v683_v1  ;;  %607 = vmatpush3.bf16.msra.mxu0 %v672_v27 }
  0x12   :  { %566 = vmatmul.mubr.msk.bf16.gmra.mxu1 %vm171_vm2, %v33_v28  ;;  %608 = vmatprep.subr.bf16.mxu0 %v673_v39 }
  0x13   :  { %236 = vmatprep.mubr.bf16.mxu1 %v683_v1  ;;  %652 = vmatpush3.bf16.msra.mxu1 %v672_v27 }
  0x14   :  { %645 = vmatprep.subr.bf16.mxu1 %v673_v39 }
  0x15   :  { %609 = vmatpush3.bf16.msra.mxu0 %v674_v40 }
  0x16   :  { %610 = vmatprep.subr.bf16.mxu0 %v675_v41 }
  0x17   :  { %653 = vmatpush3.bf16.msra.mxu1 %v674_v40 }
  0x18   :  { %559 = vmatmul.mubr.msk.bf16.gmra.mxu0 %vm58_vm1, %v50_v31  ;;  %646 = vmatprep.subr.bf16.mxu1 %v675_v41 }
  0x19   :  { %140 = vmatprep.mubr.bf16.mxu0 %v683_v1  ;;  %611 = vmatpush3.bf16.msra.mxu0 %v676_v42 }
  0x1a   :  { %567 = vmatmul.mubr.msk.bf16.gmra.mxu1 %vm171_vm2, %v34_v32  ;;  %612 = vmatprep.subr.bf16.mxu0 %v677_v43 }
  0x1b   :  { %246 = vmatprep.mubr.bf16.mxu1 %v683_v1  ;;  %654 = vmatpush3.bf16.msra.mxu1 %v676_v42 }
  0x1c   :  { %647 = vmatprep.subr.bf16.mxu1 %v677_v43 }
  0x1d   :  { %613 = vmatpush3.bf16.msra.mxu0 %v678_v44 }
  0x1e   :  { %614 = vmatprep.subr.bf16.mxu0 %v679_v45 }
  0x1f   :  { %655 = vmatpush3.bf16.msra.mxu1 %v678_v44 }
  0x20   :  { %560 = vmatmul.mubr.msk.bf16.gmra.mxu0 %vm58_vm1, %v51_v35  ;;  %648 = vmatprep.subr.bf16.mxu1 %v679_v45 }
  0x21   :  { %615 = vmatpush3.bf16.msra.mxu0 %v680_v46 }
  0x22   :  { %568 = vmatmul.mubr.msk.bf16.gmra.mxu1 %vm171_vm2, %v35_v38  ;;  %616 = vmatprep.subr.bf16.mxu0 %v681_v47 }
  0x23   :  { %656 = vmatpush3.bf16.msra.mxu1 %v680_v46 }
  0x24   :  { %649 = vmatprep.subr.bf16.mxu1 %v681_v47 }
  0x25   :  { %617 = vmatpush3.bf16.msra.mxu0 %v682_v48 }
  0x27   :  { %657 = vmatpush3.bf16.msra.mxu1 %v682_v48 }
  0xc8   :  { %v112_v50 = vpop.f32.mrf.mxu0 }
  0xca   :  { %v114_v52 = vpop.f32.mrf.mxu0  ;;  %v218_v55 = vpop.f32.mrf.mxu1 }
  0xcb   :  { %v219_v62 = vadd.f32 %v218_v55, %v112_v50 }
  0xcc   :  { %v116_v54 = vpop.f32.mrf.mxu0  ;;  %v220_v59 = vpop.f32.mrf.mxu1 }
  0xcd   :  { %v221_v60 = vadd.f32 %v220_v59, %v114_v52  ;;  %v269_v8 = vadd.f32 %v851_v63, %v219_v62 }
  0xce   :  { %v118_v58 = vpop.f32.mrf.mxu0  ;;  %v222_v1 = vpop.f32.mrf.mxu1 }
  0xcf   :  { %v223_v2 = vadd.f32 %v222_v1, %v116_v54  ;;  %v270_v5 = vadd.f32 %v849_v61, %v221_v60  ;;  %v285_v18 = vmax.f32 %v269_v8, 0.0 }
  0xd0   :  { %v122_v0 = vpop.f32.mrf.mxu0  ;;  %v224_v4 = vpop.f32.mrf.mxu1 }
  0xd1   :  { %v271_v6 = vadd.f32 %v851_v63, %v223_v2  ;;  %v225_v7 = vadd.f32 %v224_v4, %v118_v58  ;;  %v286_v15 = vmax.f32 %v270_v5, 0.0 }
  0xd2   :  { %v124_v3 = vpop.f32.mrf.mxu0  ;;  %v228_v10 = vpop.f32.mrf.mxu1 }
  0xd3   :  { %v272_v11 = vadd.f32 %v849_v61, %v225_v7  ;;  %v287_v12 = vmax.f32 %v271_v6, 0.0  ;;  %v229_v19 = vadd.f32 %v228_v10, %v122_v0 }
  0xd4   :  { %v126_v9 = vpop.f32.mrf.mxu0  ;;  %v230_v14 = vpop.f32.mrf.mxu1 }
  0xd5   :  { %v288_v16 = vmax.f32 %v272_v11, 0.0  ;;  %v231_v17 = vadd.f32 %v230_v14, %v124_v3  ;;  %v301_v24 = vpack.c.bf16 %v287_v12, %v285_v18  ;;  %v273_v30 = vadd.f32 %v851_v63, %v229_v19  ;;  %v569_v19 = vld [vmem:[%s909_s5] ss:$0 sm:$0xff] }
  0xd6   :  { %v128_v13 = vpop.f32.mrf.mxu0  ;;  %v232_v21 = vpop.f32.mrf.mxu1 }
  0xd7   :  { %v233_v22 = vadd.f32 %v232_v21, %v126_v9  ;;  %v302_v23 = vpack.c.bf16 %v288_v16, %v286_v15  ;;  %v274_v27 = vadd.f32 %v849_v61, %v231_v17  ;;  %v289_v40 = vmax.f32 %v273_v30, 0.0 }
  0xd8   :  { %v132_v20 = vpop.f32.mrf.mxu0  ;;  %v234_v26 = vpop.f32.mrf.mxu1 }
  0xd9   :  { %v275_v28 = vadd.f32 %v851_v63, %v233_v22  ;;  %v235_v29 = vadd.f32 %v234_v26, %v128_v13  ;;  %476 = vmatprep.mubr.bf16.mxu0 %v302_v23  ;;  %v290_v37 = vmax.f32 %v274_v27, 0.0 }
  0xda   :  { %v134_v25 = vpop.f32.mrf.mxu0  ;;  %v238_v32 = vpop.f32.mrf.mxu1  ;;  %477 = vmatmul.mubr.bf16.vlgmr.msra.gmra.mxu0 %v301_v24 }
  0xdb   :  { %v276_v33 = vadd.f32 %v849_v61, %v235_v29  ;;  %v291_v34 = vmax.f32 %v275_v28, 0.0  ;;  %v239_v41 = vadd.f32 %v238_v32, %v132_v20 }
  0xdc   :  { %v136_v31 = vpop.f32.mrf.mxu0  ;;  %v240_v36 = vpop.f32.mrf.mxu1 }
  0xdd   :  { %v292_v38 = vmax.f32 %v276_v33, 0.0  ;;  %v241_v39 = vadd.f32 %v240_v36, %v134_v25  ;;  %v303_v48 = vpack.c.bf16 %v291_v34, %v289_v40  ;;  %v277_v52 = vadd.f32 %v851_v63, %v239_v41 }
  0xde   :  { %v138_v35 = vpop.f32.mrf.mxu0  ;;  %v242_v43 = vpop.f32.mrf.mxu1 }
  0xdf   :  { %v243_v44 = vadd.f32 %v242_v43, %v136_v31  ;;  %v304_v45 = vpack.c.bf16 %v292_v38, %v290_v37  ;;  %v278_v49 = vadd.f32 %v849_v61, %v241_v39  ;;  %v293_v62 = vmax.f32 %v277_v52, 0.0 }
  0xe0   :  { %v142_v42 = vpop.f32.mrf.mxu0  ;;  %v244_v47 = vpop.f32.mrf.mxu1 }
  0xe1   :  { %v279_v50 = vadd.f32 %v851_v63, %v243_v44  ;;  %v245_v51 = vadd.f32 %v244_v47, %v138_v35  ;;  %484 = vmatprep.mubr.bf16.mxu0 %v304_v45  ;;  %v294_v58 = vmax.f32 %v278_v49, 0.0 }
  0xe2   :  { %v144_v46 = vpop.f32.mrf.mxu0  ;;  %v248_v53 = vpop.f32.mrf.mxu1  ;;  %485 = vmatmul.mubr.bf16.gmra.mxu0 %v303_v48 }
  0xe3   :  { %v280_v54 = vadd.f32 %v849_v61, %v245_v51  ;;  %v295_v55 = vmax.f32 %v279_v50, 0.0  ;;  %v249_v0 = vadd.f32 %v248_v53, %v142_v42 }
  0xe4   :  { %v146_v56 = vpop.f32.mrf.mxu0  ;;  %v250_v57 = vpop.f32.mrf.mxu1 }
  0xe5   :  { %v296_v59 = vmax.f32 %v280_v54, 0.0  ;;  %v251_v60 = vadd.f32 %v250_v57, %v144_v46  ;;  %v305_v6 = vpack.c.bf16 %v295_v55, %v293_v62  ;;  %v281_v10 = vadd.f32 %v851_v63, %v249_v0 }
  0xe6   :  { %v252_v1 = vpop.f32.mrf.mxu1  ;;  %v148_v4 = vpop.f32.mrf.mxu0 }
  0xe7   :  { %v253_v2 = vadd.f32 %v252_v1, %v146_v56  ;;  %v306_v3 = vpack.c.bf16 %v296_v59, %v294_v58  ;;  %v282_v7 = vadd.f32 %v849_v61, %v251_v60  ;;  %v297_v15 = vmax.f32 %v281_v10, 0.0 }
  0xe8   :  { %v254_v5 = vpop.f32.mrf.mxu1 }
  0xe9   :  { %v283_v8 = vadd.f32 %v851_v63, %v253_v2  ;;  %v255_v9 = vadd.f32 %v254_v5, %v148_v4  ;;  %492 = vmatprep.mubr.bf16.mxu0 %v306_v3  ;;  %v298_v13 = vmax.f32 %v282_v7, 0.0 }
  0xea   :  { %493 = vmatmul.mubr.bf16.gmra.mxu0 %v305_v6 }
  0xeb   :  { %v284_v11 = vadd.f32 %v849_v61, %v255_v9  ;;  %v299_v12 = vmax.f32 %v283_v8, 0.0 }
  0xed   :  { %v300_v14 = vmax.f32 %v284_v11, 0.0  ;;  %v307_v17 = vpack.c.bf16 %v299_v12, %v297_v15 }
  0xef   :  { %v308_v16 = vpack.c.bf16 %v300_v14, %v298_v13 }
  0xf1   :  { %500 = vmatprep.mubr.bf16.mxu1 %v308_v16 }
  0xf2   :  { %501 = vmatmul.mubr.bf16.vlgmr.msra.gmra.mxu1 %v307_v17 }
 0x19a   :  { %v618_v18 = vpop.f32.mrf.mxu0 }
 0x19c   :  { %v619_v20 = vpop.f32.mrf.mxu0 }
 0x19d   :  { %v620_v21 = vadd.f32 %v619_v20, %v618_v18 }
 0x19e   :  { %v621_v22 = vpop.f32.mrf.mxu0 }
 0x19f   :  { %v479_v63 = vadd.f32 %v620_v21, %v569_v19 }
 0x1a0   :  { %v622_v23 = vpop.f32.mrf.mxu0 }
 0x1a1   :  { %v594_v61 = vpack.c.bf16 %v479_v63, %v479_v63  ;;  %v623_v24 = vadd.f32 %v622_v23, %v621_v22 }
 0x1a2   :  { %v624_v25 = vpop.f32.mrf.mxu0 }
 0x1a3   :  { %542 = vst.msk [vmem:[%s910_s6] sm:$0xf] %vm541_vm3, %v594_v61  ;;  %v482_v26 = vadd.f32 %v623_v24, %v569_v19 }
 0x1a4   :  { %v625_v27 = vpop.f32.mrf.mxu0 }
 0x1a5   :  { %v595_v28 = vpack.c.bf16 %v482_v26, %v482_v26  ;;  %v626_v29 = vadd.f32 %v625_v27, %v624_v25 }
 0x1a6   :  { %v627_v30 = vpop.f32.mrf.mxu0 }
 0x1a7   :  { %543 = vst.msk [vmem:[%s910_s6 + $0x4] sm:$0xf] %vm541_vm3, %v595_v28  ;;  %v487_v31 = vadd.f32 %v626_v29, %v569_v19 }
 0x1a8   :  { %v628_v32 = vpop.f32.mrf.mxu0 }
 0x1a9   :  { %v596_v33 = vpack.c.bf16 %v487_v31, %v487_v31  ;;  %v629_v34 = vadd.f32 %v628_v32, %v627_v30 }
 0x1aa   :  { %v630_v35 = vpop.f32.mrf.mxu0 }
 0x1ab   :  { %544 = vst.msk [vmem:[%s910_s6 + $0x8] sm:$0xf] %vm541_vm3, %v596_v33  ;;  %v490_v36 = vadd.f32 %v629_v34, %v569_v19 }
 0x1ac   :  { %v631_v37 = vpop.f32.mrf.mxu0 }
 0x1ad   :  { %v597_v38 = vpack.c.bf16 %v490_v36, %v490_v36  ;;  %v632_v39 = vadd.f32 %v631_v37, %v630_v35 }
 0x1ae   :  { %v633_v40 = vpop.f32.mrf.mxu0 }
 0x1af   :  { %545 = vst.msk [vmem:[%s910_s6 + $0xc] sm:$0xf] %vm541_vm3, %v597_v38  ;;  %v495_v41 = vadd.f32 %v632_v39, %v569_v19 }
 0x1b0   :  { %v634_v42 = vpop.f32.mrf.mxu0 }
 0x1b1   :  { %v598_v43 = vpack.c.bf16 %v495_v41, %v495_v41  ;;  %v635_v44 = vadd.f32 %v634_v42, %v633_v40 }
 0x1b2   :  { %v636_v45 = vpop.f32.mrf.mxu1 }
 0x1b3   :  { %546 = vst.msk [vmem:[%s910_s6 + $0x10] sm:$0xf] %vm541_vm3, %v598_v43  ;;  %v498_v46 = vadd.f32 %v635_v44, %v569_v19 }
 0x1b4   :  { %v637_v47 = vpop.f32.mrf.mxu1 }
 0x1b5   :  { %v599_v48 = vpack.c.bf16 %v498_v46, %v498_v46  ;;  %v638_v49 = vadd.f32 %v637_v47, %v636_v45 }
 0x1b6   :  { %v639_v50 = vpop.f32.mrf.mxu1 }
 0x1b7   :  { %547 = vst.msk [vmem:[%s910_s6 + $0x14] sm:$0xf] %vm541_vm3, %v599_v48  ;;  %v503_v51 = vadd.f32 %v638_v49, %v569_v19 }
 0x1b8   :  { %v640_v52 = vpop.f32.mrf.mxu1 }
 0x1b9   :  { %v600_v53 = vpack.c.bf16 %v503_v51, %v503_v51  ;;  %v641_v54 = vadd.f32 %v640_v52, %v639_v50 }
 0x1bb   :  { %548 = vst.msk [vmem:[%s910_s6 + $0x18] sm:$0xf] %vm541_vm3, %v600_v53  ;;  %v506_v55 = vadd.f32 %v641_v54, %v569_v19 }
 0x1bd   :  { %v601_v56 = vpack.c.bf16 %v506_v55, %v506_v55 }
 0x1bf   :  { %549 = vst.msk [vmem:[%s910_s6 + $0x1c] sm:$0xf] %vm541_vm3, %v601_v56 }

</bundles_post_ra>
